<compile_context>
chip_gen: v5e
topology: v5e:2x2
jax: 0.10.0
libtpu: 0.0.40
codegen_flags: <defaults>
</compile_context>

<pallas_src>
import jax
import jax.numpy as jnp
from jax import lax
from jax.experimental import pallas as pl
from jax.experimental.pallas import tpu as pltpu


def _elu(x):
    # ELU(alpha=1); exp only sees min(x, 0) so the untaken branch never overflows.
    xm = jnp.minimum(x, 0.0)
    return jnp.where(x > 0, x, jnp.exp(xm) - 1.0)


def critic_kernel(xt_ref, w1t_ref, b1_ref, w2t_ref, b2_ref, wh_ref, bh_ref, out_ref):
    # Batch sits on lanes: every activation tile is (H, tile_b) and lane-dense.
    xt = xt_ref[...]                                                    # (D, tb) bf16/f32
    # encoder layer 1: Linear + ELU (f32 accumulation, f32 ELU)
    h = jnp.dot(w1t_ref[...], xt, preferred_element_type=jnp.float32)  # (H, tb)
    h = _elu(h + b1_ref[...])
    # encoder layer 2: Linear + ELU
    h = jnp.dot(w2t_ref[...], h.astype(w2t_ref.dtype),
                preferred_element_type=jnp.float32)                    # (H, tb)
    h = _elu(h + b2_ref[...])
    # value head Linear(H, 1): (1,H) x (H,tb) -> (1,tb); lane-dense output,
    # no XLU transpose of the activation tile.
    v = jnp.dot(wh_ref[...], h, preferred_element_type=jnp.float32)    # (1, tb)
    out_ref[...] = v + bh_ref[...]


def _num_tensorcores():
    """Best-effort TensorCores-per-chip query (v7x=2, v5e/v6e=1)."""
    try:
        info = pltpu.get_tpu_info()
        for attr in ("num_cores", "core_count", "tensorcores_per_chip", "num_tensorcores"):
            v = getattr(info, attr, None)
            if isinstance(v, int) and v > 0:
                return v
    except Exception:
        pass
    try:
        v = getattr(jax.devices()[0], "num_cores", None)
        if isinstance(v, int) and v > 0:
            return v
    except Exception:
        pass
    return 1


def critic_forward(obs, params, *, tile_b=2048, use_bf16=True):
    """obs: [B, D] float -> value: [B] float32 (mean of the value distribution)."""
    w1, b1, w2, b2, wh, bh = params
    B, D = obs.shape
    H = w1.shape[1]

    # ---- batch tiling: batch is the LANE axis, so tiles are 128-aligned ----
    n_cores = _num_tensorcores()
    b_ceil = pl.cdiv(B, 128) * 128
    tile_b = max(128, (min(int(tile_b), 4096) // 128) * 128)
    if n_cores > 1:
        # v7x: balanced tiles so each TensorCore gets >= 1 full, minimally
        # padded tile via the "parallel" grid axis.
        per_core = pl.cdiv(pl.cdiv(b_ceil, n_cores), 128) * 128
        tile_b = min(tile_b, max(128, per_core))
    else:
        # Single-TC chips (v5e/v6e): one biggest tile, never force a split.
        tile_b = min(tile_b, b_ceil)
    n_tiles = pl.cdiv(B, tile_b)
    B_pad = n_tiles * tile_b

    # ---- dtypes & layout: bf16 streaming operands, f32 accum / bias / head --
    in_dt = jnp.bfloat16 if use_bf16 else jnp.float32
    obs_t = jnp.asarray(obs, in_dt).T                       # (D, B) batch-on-lanes
    if B_pad != B:
        obs_t = jnp.pad(obs_t, ((0, 0), (0, B_pad - B)))
    w1t = jnp.asarray(w1, jnp.float32).T.astype(in_dt)      # (H, D)
    w2t = jnp.asarray(w2, jnp.float32).T.astype(in_dt)      # (H, H)
    b1_c = jnp.asarray(b1, jnp.float32).reshape(H, 1)
    b2_c = jnp.asarray(b2, jnp.float32).reshape(H, 1)
    wh_row = jnp.asarray(wh, jnp.float32).reshape(1, H)
    bh_c = jnp.asarray(bh, jnp.float32).reshape(1, 1)

    itemsize = jnp.dtype(in_dt).itemsize
    # double-buffered obs tile + resident weights/biases + f32 activations + out row
    vmem_est = (2 * D * tile_b * itemsize
                + 2 * (H * D + H * H) * itemsize
                + 2 * (3 * H + 1) * 4
                + 2 * 2 * H * tile_b * 4
                + 2 * tile_b * 4)
    vmem_limit = int(min(max(2 * vmem_est, 4 << 20), 64 << 20))

    flops = 2 * B_pad * (D * H + H * H + H)
    bytes_accessed = (B_pad * D * itemsize
                      + (D * H + H * H) * itemsize
                      + (3 * H + 1) * 4
                      + B_pad * 4)

    rep = lambda i: (0, 0)  # weights/biases: constant block index -> stay resident
    out = pl.pallas_call(
        critic_kernel,
        out_shape=jax.ShapeDtypeStruct((1, B_pad), jnp.float32),
        grid_spec=pltpu.PrefetchScalarGridSpec(
            num_scalar_prefetch=0,
            grid=(n_tiles,),
            in_specs=[
                pl.BlockSpec((D, tile_b), lambda i: (0, i)),  # obs^T tile (batch on lanes)
                pl.BlockSpec((H, D), rep),                    # W1^T
                pl.BlockSpec((H, 1), rep),                    # b1 (column)
                pl.BlockSpec((H, H), rep),                    # W2^T
                pl.BlockSpec((H, 1), rep),                    # b2 (column)
                pl.BlockSpec((1, H), rep),                    # W_head as a row
                pl.BlockSpec((1, 1), rep),                    # b_head
            ],
            out_specs=pl.BlockSpec((1, tile_b), lambda i: (0, i)),
        ),
        compiler_params=pltpu.CompilerParams(
            dimension_semantics=("parallel",),
            vmem_limit_bytes=vmem_limit,
        ),
        cost_estimate=pl.CostEstimate(
            flops=flops,
            transcendentals=2 * B_pad * H,
            bytes_accessed=bytes_accessed,
        ),
    )(obs_t, w1t, b1_c, w2t, b2_c, wh_row, bh_c)
    return out[0, :B]


def init_params(key, obs_dim, hidden):
    # tf_init ~ fan-in init; deterministic via PRNGKey.
    k1, k2, k3 = jax.random.split(key, 3)
    w1 = jax.random.normal(k1, (obs_dim, hidden), jnp.float32) * (1.0 / jnp.sqrt(obs_dim))
    b1 = jnp.zeros((hidden,), jnp.float32)
    w2 = jax.random.normal(k2, (hidden, hidden), jnp.float32) * (1.0 / jnp.sqrt(hidden))
    b2 = jnp.zeros((hidden,), jnp.float32)
    wh = jax.random.normal(k3, (hidden, 1), jnp.float32) * (1.0 / jnp.sqrt(hidden))
    bh = jnp.zeros((1, 1), jnp.float32)
    return (w1, b1, w2, b2, wh, bh)


def critic_forward_ref(obs, params, use_bf16=True):
    # Pure-JAX reference; use_bf16=True matches the kernel's operand precision.
    w1, b1, w2, b2, wh, bh = params
    in_dt = jnp.bfloat16 if use_bf16 else jnp.float32
    h = jnp.dot(obs.astype(in_dt), w1.astype(in_dt),
                preferred_element_type=jnp.float32)
    h = _elu(h + b1.reshape(1, -1))
    h = jnp.dot(h.astype(in_dt), w2.astype(in_dt),
                preferred_element_type=jnp.float32)
    h = _elu(h + b2.reshape(1, -1))
    v = jnp.dot(h, wh.reshape(-1, 1), precision=lax.Precision.HIGHEST,
                preferred_element_type=jnp.float32) + bh.reshape(1, 1)
    return v[:, 0]


if __name__ == "__main__":
    key = jax.random.PRNGKey(0)
    k_obs, k_obs2, k_par = jax.random.split(key, 3)

    D, H = 32, 64                      # small dreamer-latent-like shapes
    params = init_params(k_par, D, H)

    # small batch (single tile, batch padded 8 -> 128)
    obs_small = jax.random.normal(k_obs, (8, D), jnp.float32)
    val_small = jax.block_until_ready(critic_forward(obs_small, params))
    assert val_small.shape == (8,)
    ref_small = critic_forward_ref(obs_small, params)
    ref_small_f32 = critic_forward_ref(obs_small, params, use_bf16=False)
    assert jnp.allclose(val_small, ref_small, atol=5e-3, rtol=5e-3), (val_small, ref_small)
    assert jnp.allclose(val_small, ref_small_f32, atol=5e-2, rtol=5e-2), (val_small, ref_small_f32)

    # ragged batch exercising zero-padding (and a 2-step parallel grid on v7x)
    obs_big = jax.random.normal(k_obs2, (300, D), jnp.float32)
    val_big = jax.block_until_ready(critic_forward(obs_big, params))
    assert val_big.shape == (300,)
    ref_big = critic_forward_ref(obs_big, params)
    ref_big_f32 = critic_forward_ref(obs_big, params, use_bf16=False)
    assert jnp.allclose(val_big, ref_big, atol=5e-3, rtol=5e-3), (val_big, ref_big)
    assert jnp.allclose(val_big, ref_big_f32, atol=5e-2, rtol=5e-2), (val_big, ref_big_f32)

    # TODO(synk): dh.make may wrap the head output in a Normal/MSE distribution
    # object; the kernel returns its mean (the value estimate), which is the
    # quantity consumed by the a2c loss.
    print("KERNEL_OK")
</pallas_src>

<mosaic_0001>
module attributes {stable_mosaic.version = 11 : i64} {
  func.func @critic_kernel(%arg0: i32, %arg1: memref<32x128xbf16, #tpu.memory_space<vmem>>, %arg2: memref<64x32xbf16, #tpu.memory_space<vmem>>, %arg3: memref<64x1xf32, #tpu.memory_space<vmem>>, %arg4: memref<64x64xbf16, #tpu.memory_space<vmem>>, %arg5: memref<64x1xf32, #tpu.memory_space<vmem>>, %arg6: memref<1x64xf32, #tpu.memory_space<vmem>>, %arg7: memref<1x1xf32, #tpu.memory_space<vmem>>, %arg8: memref<1x128xf32, #tpu.memory_space<vmem>>) attributes {dimension_semantics = [#tpu.dimension_semantics<parallel>], iteration_bounds = array<i64: 1>, scalar_prefetch = 0 : i64, scratch_operands = 0 : i64, tpu.core_type = #tpu.core_type<tc>, window_params = [{transform_indices = @transform_0, window_bounds = array<i64: 32, 128>}, {pipeline_mode = #tpu.pipeline_mode<synchronous>, transform_indices = @transform_1, window_bounds = array<i64: 64, 32>}, {pipeline_mode = #tpu.pipeline_mode<synchronous>, transform_indices = @transform_2, window_bounds = array<i64: 64, 1>}, {pipeline_mode = #tpu.pipeline_mode<synchronous>, transform_indices = @transform_3, window_bounds = array<i64: 64, 64>}, {pipeline_mode = #tpu.pipeline_mode<synchronous>, transform_indices = @transform_4, window_bounds = array<i64: 64, 1>}, {pipeline_mode = #tpu.pipeline_mode<synchronous>, transform_indices = @transform_5, window_bounds = array<i64: 1, 64>}, {pipeline_mode = #tpu.pipeline_mode<synchronous>, transform_indices = @transform_6, window_bounds = array<i64: 1, 1>}, {transform_indices = @transform_7, window_bounds = array<i64: 1, 128>}]} {
    %c0 = arith.constant 0 : index
    %c0_0 = arith.constant 0 : index
    %0 = vector.load %arg1[%c0, %c0_0] : memref<32x128xbf16, #tpu.memory_space<vmem>>, vector<32x128xbf16>
    %c0_1 = arith.constant 0 : index
    %c0_2 = arith.constant 0 : index
    %1 = vector.load %arg2[%c0_1, %c0_2] : memref<64x32xbf16, #tpu.memory_space<vmem>>, vector<64x32xbf16>
    %cst = arith.constant dense<0.000000e+00> : vector<64x128xf32>
    %2 = tpu.matmul %1, %0, %cst {dimension_numbers = #tpu.dot_dimension_numbers<[1], [0], [0], [1], [0, 0, 1, 1], [], []>} : vector<64x32xbf16>, vector<32x128xbf16>, vector<64x128xf32> -> vector<64x128xf32>
    %c0_3 = arith.constant 0 : index
    %c0_4 = arith.constant 0 : index
    %3 = vector.load %arg3[%c0_3, %c0_4] : memref<64x1xf32, #tpu.memory_space<vmem>>, vector<64x1xf32>
    %4 = vector.broadcast %3 : vector<64x1xf32> to vector<64x128xf32>
    %5 = arith.addf %2, %4 : vector<64x128xf32>
    %cst_5 = arith.constant 0.000000e+00 : f32
    %6 = vector.broadcast %cst_5 : f32 to vector<64x128xf32>
    %7 = arith.minimumf %5, %6 : vector<64x128xf32>
    %cst_6 = arith.constant 0.000000e+00 : f32
    %8 = vector.broadcast %cst_6 : f32 to vector<64x128xf32>
    %9 = arith.cmpf ogt, %5, %8 : vector<64x128xf32>
    %10 = math.exp %7 : vector<64x128xf32>
    %cst_7 = arith.constant 1.000000e+00 : f32
    %11 = vector.broadcast %cst_7 : f32 to vector<64x128xf32>
    %12 = arith.subf %10, %11 : vector<64x128xf32>
    %13 = arith.select %9, %5, %12 : vector<64x128xi1>, vector<64x128xf32>
    %c0_8 = arith.constant 0 : index
    %c0_9 = arith.constant 0 : index
    %14 = vector.load %arg4[%c0_8, %c0_9] : memref<64x64xbf16, #tpu.memory_space<vmem>>, vector<64x64xbf16>
    %15 = arith.truncf %13 : vector<64x128xf32> to vector<64x128xbf16>
    %cst_10 = arith.constant dense<0.000000e+00> : vector<64x128xf32>
    %16 = tpu.matmul %14, %15, %cst_10 {dimension_numbers = #tpu.dot_dimension_numbers<[1], [0], [0], [1], [0, 0, 1, 1], [], []>} : vector<64x64xbf16>, vector<64x128xbf16>, vector<64x128xf32> -> vector<64x128xf32>
    %c0_11 = arith.constant 0 : index
    %c0_12 = arith.constant 0 : index
    %17 = vector.load %arg5[%c0_11, %c0_12] : memref<64x1xf32, #tpu.memory_space<vmem>>, vector<64x1xf32>
    %18 = vector.broadcast %17 : vector<64x1xf32> to vector<64x128xf32>
    %19 = arith.addf %16, %18 : vector<64x128xf32>
    %cst_13 = arith.constant 0.000000e+00 : f32
    %20 = vector.broadcast %cst_13 : f32 to vector<64x128xf32>
    %21 = arith.minimumf %19, %20 : vector<64x128xf32>
    %cst_14 = arith.constant 0.000000e+00 : f32
    %22 = vector.broadcast %cst_14 : f32 to vector<64x128xf32>
    %23 = arith.cmpf ogt, %19, %22 : vector<64x128xf32>
    %24 = math.exp %21 : vector<64x128xf32>
    %cst_15 = arith.constant 1.000000e+00 : f32
    %25 = vector.broadcast %cst_15 : f32 to vector<64x128xf32>
    %26 = arith.subf %24, %25 : vector<64x128xf32>
    %27 = arith.select %23, %19, %26 : vector<64x128xi1>, vector<64x128xf32>
    %c0_16 = arith.constant 0 : index
    %c0_17 = arith.constant 0 : index
    %28 = vector.load %arg6[%c0_16, %c0_17] : memref<1x64xf32, #tpu.memory_space<vmem>>, vector<1x64xf32>
    %cst_18 = arith.constant dense<0.000000e+00> : vector<1x128xf32>
    %29 = tpu.matmul %28, %27, %cst_18 {dimension_numbers = #tpu.dot_dimension_numbers<[1], [0], [0], [1], [0, 0, 1, 1], [], []>} : vector<1x64xf32>, vector<64x128xf32>, vector<1x128xf32> -> vector<1x128xf32>
    %c0_19 = arith.constant 0 : index
    %c0_20 = arith.constant 0 : index
    %30 = vector.load %arg7[%c0_19, %c0_20] : memref<1x1xf32, #tpu.memory_space<vmem>>, vector<1x1xf32>
    %31 = vector.broadcast %30 : vector<1x1xf32> to vector<1x128xf32>
    %32 = arith.addf %29, %31 : vector<1x128xf32>
    %c0_21 = arith.constant 0 : index
    %c0_22 = arith.constant 0 : index
    %33 = vector.load %arg8[%c0_21, %c0_22] : memref<1x128xf32, #tpu.memory_space<vmem>>, vector<1x128xf32>
    tpu.vector_store %arg8[%c0_21, %c0_22], %32 {strides = array<i32>} : memref<1x128xf32, #tpu.memory_space<vmem>>, vector<1x128xf32>,
    return
  }
  func.func @transform_0(%arg0: i32) -> (i32, i32) {
    %c0_i32 = arith.constant 0 : i32
    %c0_i32_0 = arith.constant 0 : i32
    return %c0_i32, %arg0 : i32, i32
  }
  func.func @transform_1(%arg0: i32) -> (i32, i32) {
    %c0_i32 = arith.constant 0 : i32
    %c0_i32_0 = arith.constant 0 : i32
    %c0_i32_1 = arith.constant 0 : i32
    return %c0_i32, %c0_i32_0 : i32, i32
  }
  func.func @transform_2(%arg0: i32) -> (i32, i32) {
    %c0_i32 = arith.constant 0 : i32
    %c0_i32_0 = arith.constant 0 : i32
    %c0_i32_1 = arith.constant 0 : i32
    return %c0_i32, %c0_i32_0 : i32, i32
  }
  func.func @transform_3(%arg0: i32) -> (i32, i32) {
    %c0_i32 = arith.constant 0 : i32
    %c0_i32_0 = arith.constant 0 : i32
    %c0_i32_1 = arith.constant 0 : i32
    return %c0_i32, %c0_i32_0 : i32, i32
  }
  func.func @transform_4(%arg0: i32) -> (i32, i32) {
    %c0_i32 = arith.constant 0 : i32
    %c0_i32_0 = arith.constant 0 : i32
    %c0_i32_1 = arith.constant 0 : i32
    return %c0_i32, %c0_i32_0 : i32, i32
  }
  func.func @transform_5(%arg0: i32) -> (i32, i32) {
    %c0_i32 = arith.constant 0 : i32
    %c0_i32_0 = arith.constant 0 : i32
    %c0_i32_1 = arith.constant 0 : i32
    return %c0_i32, %c0_i32_0 : i32, i32
  }
  func.func @transform_6(%arg0: i32) -> (i32, i32) {
    %c0_i32 = arith.constant 0 : i32
    %c0_i32_0 = arith.constant 0 : i32
    %c0_i32_1 = arith.constant 0 : i32
    return %c0_i32, %c0_i32_0 : i32, i32
  }
  func.func @transform_7(%arg0: i32) -> (i32, i32) {
    %c0_i32 = arith.constant 0 : i32
    %c0_i32_0 = arith.constant 0 : i32
    return %c0_i32, %arg0 : i32, i32
  }
}

</mosaic_0001>

<bundles_post_ra>
// kernel: tpu_custom_call.1
= control target key start
LH: loop header
LB: loop body
LE: loop exit
PB: predicated region body
PF: predicated region fallthrough
CT: control target
= control target key end

     0   :  { %s712_s0 = inlined_call_operand.vmem [shape: bf16[32,128], index: 0, kind: input, shape index: {}]   ;;  %s713_s1 = inlined_call_operand.vmem [shape: bf16[64,32], index: 1, kind: input, shape index: {}]   ;;  %s714_s2 = inlined_call_operand.vmem [shape: f32[64,1], index: 2, kind: input, shape index: {}]   ;;  %s715_s3 = inlined_call_operand.vmem [shape: bf16[64,64], index: 3, kind: input, shape index: {}]   ;;  %s716_s4 = inlined_call_operand.vmem [shape: f32[64,1], index: 4, kind: input, shape index: {}]   ;;  %s717_s5 = inlined_call_operand.vmem [shape: f32[1,64], index: 5, kind: input, shape index: {}]   ;;  %s718_s6 = inlined_call_operand.<no memory space> [shape: f32[1,1], index: 6, kind: input, shape index: {}]   ;;  %s719_s7 = inlined_call_operand.hbm [shape: f32[1,128], index: 7, kind: output, shape index: {}]  }
   0x1   :  { %v12_v0 = vstv %s718_s6 }
   0x2   :  { %13 = vst [vmem:[#allocation2] sm:$0x1] %v12_v0 }
   0x3   :  { %v496_v1 = vld [vmem:[%s712_s0 + $0x8] sm:$0xff]  ;;  %v48_v2 = vld [vmem:[%s714_s2 + $0x30] sm:$0xff]  ;;  %v574_v3 = vmov 0   ;;  %v495_v4 = vld [vmem:[%s712_s0] sm:$0xff] }
   0x4   :  { %513 = vset.pattern.permute.xlu0 %v574_v3  ;;  %514 = vset.pattern.permute.xlu1 %v574_v3  ;;  %v46_v5 = vld [vmem:[%s714_s2 + $0x20] sm:$0xff]  ;;  %v500_v7 = vld [vmem:[%s713_s1 + $0x18] sm:$0xff] }
   0x5   :  { %141 = vmatpush.bf16.msra.mxu0 %v496_v1  ;;  %505 = vmatpush.bf16.msra.mxu2 %v496_v1  ;;  %v497_v6 = vld [vmem:[%s713_s1] sm:$0xff] }
   0x6   :  { %82 = vperm.xlu0 %513, %v48_v2   ;;  %72 = vperm.xlu1 %514, %v46_v5  }
   0x7   :  { %515 = vset.pattern.permute.xlu2 %v574_v3 }
   0x8   :  { %14 = vsyncpa [#allocation4], 0  ;;  %vm122_vm0 = vcmask 261120   ;;  %v49_v8 = vld [vmem:[%s714_s2 + $0x38] sm:$0xff]  ;;  %v47_v9 = vld [vmem:[%s714_s2 + $0x28] sm:$0xff]  ;;  %vm292_vm9 = vcmask 523264  }
   0x9   :  { %142 = vmatpush.bf16.msra.mxu0 %v495_v4  ;;  %506 = vmatpush.bf16.msra.mxu2 %v495_v4  ;;  %v44_v10 = vld [vmem:[%s714_s2 + $0x10] sm:$0xff]  ;;  %v45_v11 = vld [vmem:[%s714_s2 + $0x18] sm:$0xff]  ;;  %v42_v12 = vld [vmem:[%s714_s2] sm:$0xff]  ;;  %s575_s26 = smov [#allocation3]   ;;  %s421_s30 = sshll.u32 %s719_s7, 4  ;;  %s422_s30 = int_to_ptr.hbm [resolvable:$true] %s421_s30 }
   0xa   :  { %62 = vperm.xlu2 %515, %v44_v10   ;;  %v43_v13 = vld [vmem:[%s714_s2 + $0x8] sm:$0xff]  ;;  %v231_v15 = vld [vmem:[%s716_s4 + $0x38] sm:$0xff]  ;;  %v230_v16 = vld [vmem:[%s716_s4 + $0x30] sm:$0xff]  ;;  %s419_s27 = sshll.u32 %s575_s26, 4  ;;  %s420_s27 = int_to_ptr.vmem [resolvable:$true] %s419_s27 }
   0xb   :  { %v498_v14 = vld [vmem:[%s713_s1 + $0x8] sm:$0xff]  ;;  %v228_v18 = vld [vmem:[%s716_s4 + $0x20] sm:$0xff]  ;;  %v227_v19 = vld [vmem:[%s716_s4 + $0x18] sm:$0xff] }
   0xc   :  { %454 = vmatmul.msk.bf16.vlgmr.msra.gmra.mxu0 %vm122_vm0, %v497_v6  ;;  %457 = vmatmul.msk.bf16.vlgmr.msra.gmra.mxu2 %vm122_vm0, %v500_v7  ;;  %v229_v17 = vld [vmem:[%s716_s4 + $0x28] sm:$0xff]  ;;  %v226_v20 = vld [vmem:[%s716_s4 + $0x10] sm:$0xff]  ;;  %v224_v23 = vld [vmem:[%s716_s4] sm:$0xff] }
   0xd   :  { %v499_v21 = vld [vmem:[%s713_s1 + $0x10] sm:$0xff]  ;;  %v225_v22 = vld [vmem:[%s716_s4 + $0x8] sm:$0xff]  ;;  %v383_v24 = vld [vmem:[#allocation2] sm:$0x1] }
   0xe   :  { %87 = vperm.xlu0 %513, %v49_v8   ;;  %77 = vperm.xlu1 %514, %v47_v9  }
  0x12   :  { %67 = vperm.xlu2 %515, %v45_v11  }
  0x16   :  { %52 = vperm.xlu0 %513, %v42_v12   ;;  %57 = vperm.xlu1 %514, %v43_v13  }
  0x1a   :  { %269 = vperm.xlu2 %515, %v231_v15  }
  0x1c   :  { %455 = vmatmul.msk.bf16.gmra.mxu0 %vm122_vm0, %v498_v14 }
  0x1e   :  { %264 = vperm.xlu0 %513, %v230_v16   ;;  %259 = vperm.xlu1 %514, %v229_v17  }
  0x22   :  { %254 = vperm.xlu2 %515, %v228_v18  }
  0x26   :  { %249 = vperm.xlu0 %513, %v227_v19   ;;  %244 = vperm.xlu1 %514, %v226_v20  }
  0x2a   :  { %239 = vperm.xlu2 %515, %v225_v22  }
  0x2c   :  { %456 = vmatmul.msk.bf16.gmra.mxu0 %vm122_vm0, %v499_v21 }
  0x2e   :  { %234 = vperm.xlu0 %513, %v224_v23   ;;  %386 = vperm.xlu1 %514, %v383_v24  }
  0x64   :  { %v63_v40 = vpop.permute.xlu2 %62 }
  0x6c   :  { %v68_v49 = vpop.permute.xlu2 %67 }
  0x78   :  { %v83_v26 = vpop.permute.xlu0 %82  ;;  %v73_v32 = vpop.permute.xlu1 %72 }
  0x80   :  { %v88_v33 = vpop.permute.xlu0 %87  ;;  %v78_v41 = vpop.permute.xlu1 %77 }
  0x88   :  { %v58_v53 = vpop.permute.xlu1 %57  ;;  %v53_v56 = vpop.permute.xlu0 %52 }
  0x89   :  { %v144_v25 = vpop.f32.mrf.mxu0 }
  0x8a   :  { %v145_v60 = vadd.f32 %v144_v25, %v53_v56 }
  0x8c   :  { %v164_v3 = vmin.f32 %v145_v60, 0.0  ;;  %vm172_vm8 = vcmp.gt.f32.partialorder %v145_v60, 0.0 }
  0x8e   :  { %v180_v7 = vmul.f32 1.442695, %v164_v3 }
  0x8f   :  { %v159_v27 = vpop.f32.mrf.mxu2 }
  0x90   :  { %v160_v28 = vadd.f32 %v159_v27, %v83_v26 }
  0x91   :  { %v146_v29 = vpop.f32.mrf.mxu0 }
  0x92   :  { %v170_v30 = vmin.f32 %v160_v28, 0.0  ;;  %vm178_vm1 = vcmp.gt.f32.partialorder %v160_v28, 0.0  ;;  %v147_v57 = vadd.f32 %v146_v29, %v58_v53  ;;  %v501_v29 = vld [vmem:[%s715_s3] sm:$0xff] }
  0x94   :  { %v192_v31 = vmul.f32 1.442695, %v170_v30  ;;  %v165_v63 = vmin.f32 %v147_v57, 0.0  ;;  %vm173_vm7 = vcmp.gt.f32.partialorder %v147_v57, 0.0  ;;  %v503_v30 = vld [vmem:[%s715_s3 + $0x10] sm:$0xff] }
  0x96   :  { %516 = vpow2.f32 %v192_v31  ;;  %v182_v5 = vmul.f32 1.442695, %v165_v63  ;;  %v502_v31 = vld [vmem:[%s715_s3 + $0x8] sm:$0xff] }
  0x97   :  { %v161_v34 = vpop.f32.mrf.mxu2 }
  0x98   :  { %v162_v35 = vadd.f32 %v161_v34, %v88_v33 }
  0x99   :  { %v149_v36 = vpop.f32.mrf.mxu0 }
  0x9a   :  { %v171_v37 = vmin.f32 %v162_v35, 0.0  ;;  %vm179_vm2 = vcmp.gt.f32.partialorder %v162_v35, 0.0  ;;  %v150_v54 = vadd.f32 %v149_v36, %v63_v40  ;;  %v270_v36 = vpop.permute.xlu2 %269  ;;  %v260_v40 = vpop.permute.xlu1 %259 }
  0x9c   :  { %v194_v38 = vmul.f32 1.442695, %v171_v37  ;;  %v517_v39 = vpop.eup %516  ;;  %v166_v59 = vmin.f32 %v150_v54, 0.0  ;;  %vm174_vm6 = vcmp.gt.f32.partialorder %v150_v54, 0.0  ;;  %v265_v37 = vpop.permute.xlu0 %264 }
  0x9d   :  { %v464_v43 = vadd.f32 -1.0, %v517_v39 }
  0x9e   :  { %518 = vpow2.f32 %v194_v38  ;;  %v184_v2 = vmul.f32 1.442695, %v166_v59 }
  0x9f   :  { %v210_v46 = vsel %vm178_vm1, %v160_v28, %v464_v43 }
  0xa1   :  { %v151_v42 = vpop.f32.mrf.mxu0 }
  0xa2   :  { %v152_v51 = vadd.f32 %v151_v42, %v68_v49 }
  0xa4   :  { %v519_v44 = vpop.eup %518  ;;  %v167_v58 = vmin.f32 %v152_v51, 0.0  ;;  %vm175_vm5 = vcmp.gt.f32.partialorder %v152_v51, 0.0  ;;  %v250_v43 = vpop.permute.xlu0 %249 }
  0xa5   :  { %v465_v45 = vadd.f32 -1.0, %v519_v44 }
  0xa6   :  { %v186_v0 = vmul.f32 1.442695, %v167_v58 }
  0xa7   :  { %v211_v47 = vsel %vm179_vm2, %v162_v35, %v465_v45 }
  0xa8   :  { %v223_v48 = vpack.c.bf16 %v211_v47, %v210_v46 }
  0xa9   :  { %v154_v50 = vpop.f32.mrf.mxu0 }
  0xaa   :  { %v155_v52 = vadd.f32 %v154_v50, %v73_v32  ;;  %309 = vmatpush.bf16.msra.mxu1 %v223_v48  ;;  %507 = vmatpush.bf16.msra.mxu3 %v223_v48  ;;  %v504_v32 = vld [vmem:[%s715_s3 + $0x18] sm:$0xff] }
  0xac   :  { %v168_v55 = vmin.f32 %v155_v52, 0.0  ;;  %vm176_vm3 = vcmp.gt.f32.partialorder %v155_v52, 0.0  ;;  %v235_v59 = vpop.permute.xlu0 %234 }
  0xae   :  { %v188_v61 = vmul.f32 1.442695, %v168_v55 }
  0xb0   :  { %520 = vpow2.f32 %v188_v61 }
  0xb1   :  { %v156_v62 = vpop.f32.mrf.mxu0  ;;  %522 = vpow2.f32 %v186_v0 }
  0xb2   :  { %v157_v1 = vadd.f32 %v156_v62, %v78_v41  ;;  %524 = vpow2.f32 %v184_v2  ;;  %v255_v41 = vpop.permute.xlu2 %254 }
  0xb4   :  { %v169_v4 = vmin.f32 %v157_v1, 0.0  ;;  %vm177_vm4 = vcmp.gt.f32.partialorder %v157_v1, 0.0 }
  0xb6   :  { %v190_v6 = vmul.f32 1.442695, %v169_v4  ;;  %v521_v8 = vpop.eup %520 }
  0xb7   :  { %v523_v9 = vpop.eup %522  ;;  %v462_v11 = vadd.f32 -1.0, %v521_v8 }
  0xb8   :  { %526 = vpow2.f32 %v190_v6  ;;  %v525_v10 = vpop.eup %524  ;;  %v461_v14 = vadd.f32 -1.0, %v523_v9 }
  0xb9   :  { %528 = vpow2.f32 %v182_v5  ;;  %v208_v16 = vsel %vm176_vm3, %v155_v52, %v462_v11  ;;  %v460_v18 = vadd.f32 -1.0, %v525_v10 }
  0xba   :  { %530 = vpow2.f32 %v180_v7  ;;  %v207_v21 = vsel %vm175_vm5, %v152_v51, %v461_v14  ;;  %v245_v51 = vpop.permute.xlu1 %244 }
  0xbb   :  { %v206_v23 = vsel %vm174_vm6, %v150_v54, %v460_v18 }
  0xbc   :  { %v221_v25 = vpack.c.bf16 %v207_v21, %v206_v23 }
  0xbe   :  { %v527_v12 = vpop.eup %526 }
  0xbf   :  { %v463_v13 = vadd.f32 -1.0, %v527_v12  ;;  %v529_v15 = vpop.eup %528 }
  0xc0   :  { %v531_v19 = vpop.eup %530  ;;  %v459_v22 = vadd.f32 -1.0, %v529_v15 }
  0xc1   :  { %v209_v17 = vsel %vm177_vm4, %v157_v1, %v463_v13  ;;  %v458_v24 = vadd.f32 -1.0, %v531_v19 }
  0xc2   :  { %v222_v20 = vpack.c.bf16 %v209_v17, %v208_v16  ;;  %v205_v26 = vsel %vm173_vm7, %v147_v57, %v459_v22  ;;  %v240_v57 = vpop.permute.xlu2 %239 }
  0xc3   :  { %v204_v27 = vsel %vm172_vm8, %v145_v60, %v458_v24 }
  0xc4   :  { %310 = vmatpush.bf16.msra.mxu1 %v222_v20  ;;  %508 = vmatpush.bf16.msra.mxu3 %v222_v20  ;;  %v220_v28 = vpack.c.bf16 %v205_v26, %v204_v27 }
  0xc8   :  { %311 = vmatpush.bf16.msra.mxu1 %v221_v25  ;;  %509 = vmatpush.bf16.msra.mxu3 %v221_v25 }
  0xcc   :  { %312 = vmatpush.bf16.msra.mxu1 %v220_v28  ;;  %510 = vmatpush.bf16.msra.mxu3 %v220_v28 }
  0xcf   :  { %482 = vmatmul.msk.bf16.vlgmr.msra.gmra.mxu1 %vm292_vm9, %v501_v29  ;;  %484 = vmatmul.msk.bf16.vlgmr.msra.gmra.mxu3 %vm292_vm9, %v503_v30 }
  0xdf   :  { %483 = vmatmul.msk.bf16.gmra.mxu1 %vm292_vm9, %v502_v31  ;;  %485 = vmatmul.msk.bf16.gmra.mxu3 %vm292_vm9, %v504_v32  ;;  %v382_v32 = vld [vmem:[%s717_s5] sm:$0x1] }
 0x14c   :  { %v314_v33 = vpop.f32.mrf.mxu1 }
 0x14d   :  { %v315_v63 = vadd.f32 %v314_v33, %v235_v59 }
 0x14f   :  { %v334_v5 = vmin.f32 %v315_v63, 0.0  ;;  %vm342_vm1 = vcmp.gt.f32.partialorder %v315_v63, 0.0 }
 0x151   :  { %v350_v11 = vmul.f32 1.442695, %v334_v5 }
 0x152   :  { %v324_v34 = vpop.f32.mrf.mxu3 }
 0x153   :  { %v325_v47 = vadd.f32 %v324_v34, %v255_v41  ;;  %v387_v34 = vpop.permute.xlu1 %386 }
 0x154   :  { %v316_v35 = vpop.f32.mrf.mxu1 }
 0x155   :  { %v338_v53 = vmin.f32 %v325_v47, 0.0  ;;  %v317_v60 = vadd.f32 %v316_v35, %v240_v57  ;;  %vm346_vm13 = vcmp.gt.f32.partialorder %v325_v47, 0.0  ;;  %v389_v35 = vperm.slane %v387_v34, 0 }
 0x157   :  { %v358_v0 = vmul.f32 1.442695, %v338_v53  ;;  %v335_v3 = vmin.f32 %v317_v60, 0.0  ;;  %vm343_vm0 = vcmp.gt.f32.partialorder %v317_v60, 0.0 }
 0x159   :  { %v352_v8 = vmul.f32 1.442695, %v335_v3 }
 0x15a   :  { %v326_v38 = vpop.f32.mrf.mxu3 }
 0x15b   :  { %v327_v45 = vadd.f32 %v326_v38, %v260_v40 }
 0x15c   :  { %v319_v39 = vpop.f32.mrf.mxu1 }
 0x15d   :  { %v339_v49 = vmin.f32 %v327_v45, 0.0  ;;  %v320_v54 = vadd.f32 %v319_v39, %v245_v51  ;;  %vm347_vm12 = vcmp.gt.f32.partialorder %v327_v45, 0.0 }
 0x15f   :  { %v360_v58 = vmul.f32 1.442695, %v339_v49  ;;  %v336_v1 = vmin.f32 %v320_v54, 0.0  ;;  %vm344_vm15 = vcmp.gt.f32.partialorder %v320_v54, 0.0 }
 0x161   :  { %v354_v6 = vmul.f32 1.442695, %v336_v1 }
 0x162   :  { %v329_v42 = vpop.f32.mrf.mxu3 }
 0x163   :  { %v330_v44 = vadd.f32 %v329_v42, %v265_v37 }
 0x164   :  { %v321_v46 = vpop.f32.mrf.mxu1 }
 0x165   :  { %v340_v48 = vmin.f32 %v330_v44, 0.0  ;;  %v322_v50 = vadd.f32 %v321_v46, %v250_v43  ;;  %vm348_vm11 = vcmp.gt.f32.partialorder %v330_v44, 0.0 }
 0x167   :  { %v362_v55 = vmul.f32 1.442695, %v340_v48  ;;  %v337_v61 = vmin.f32 %v322_v50, 0.0  ;;  %vm345_vm14 = vcmp.gt.f32.partialorder %v322_v50, 0.0 }
 0x169   :  { %532 = vpow2.f32 %v362_v55  ;;  %v356_v4 = vmul.f32 1.442695, %v337_v61 }
 0x16a   :  { %v331_v52 = vpop.f32.mrf.mxu3  ;;  %534 = vpow2.f32 %v360_v58 }
 0x16b   :  { %v332_v56 = vadd.f32 %v331_v52, %v270_v36 }
 0x16d   :  { %v341_v62 = vmin.f32 %v332_v56, 0.0  ;;  %vm349_vm10 = vcmp.gt.f32.partialorder %v332_v56, 0.0 }
 0x16f   :  { %v364_v2 = vmul.f32 1.442695, %v341_v62  ;;  %v533_v7 = vpop.eup %532 }
 0x170   :  { %v535_v9 = vpop.eup %534  ;;  %v492_v13 = vadd.f32 -1.0, %v533_v7 }
 0x171   :  { %536 = vpow2.f32 %v364_v2  ;;  %v491_v16 = vadd.f32 -1.0, %v535_v9 }
 0x172   :  { %538 = vpow2.f32 %v358_v0  ;;  %v380_v18 = vsel %vm348_vm11, %v330_v44, %v492_v13 }
 0x173   :  { %540 = vpow2.f32 %v356_v4  ;;  %v379_v21 = vsel %vm347_vm12, %v327_v45, %v491_v16 }
 0x174   :  { %542 = vpow2.f32 %v354_v6 }
 0x175   :  { %544 = vpow2.f32 %v352_v8 }
 0x176   :  { %546 = vpow2.f32 %v350_v11 }
 0x177   :  { %v537_v10 = vpop.eup %536 }
 0x178   :  { %v493_v12 = vadd.f32 -1.0, %v537_v10  ;;  %v539_v14 = vpop.eup %538 }
 0x179   :  { %v541_v17 = vpop.eup %540  ;;  %v490_v19 = vadd.f32 -1.0, %v539_v14 }
 0x17a   :  { %v381_v15 = vsel %vm349_vm10, %v332_v56, %v493_v12  ;;  %v543_v20 = vpop.eup %542  ;;  %v489_v22 = vadd.f32 -1.0, %v541_v17 }
 0x17b   :  { %401 = vmatpush.msrb.mxu2 %v381_v15  ;;  %v545_v23 = vpop.eup %544  ;;  %v378_v24 = vsel %vm346_vm13, %v325_v47, %v490_v19  ;;  %v488_v25 = vadd.f32 -1.0, %v543_v20 }
 0x17c   :  { %v547_v26 = vpop.eup %546  ;;  %v377_v27 = vsel %vm345_vm14, %v322_v50, %v489_v22  ;;  %v487_v28 = vadd.f32 -1.0, %v545_v23 }
 0x17d   :  { %402 = vmatpush.msrb.mxu2 %v380_v18  ;;  %v376_v29 = vsel %vm344_vm15, %v320_v54, %v488_v25  ;;  %v486_v30 = vadd.f32 -1.0, %v547_v26 }
 0x17e   :  { %v375_v31 = vsel %vm343_vm0, %v317_v60, %v487_v28 }
 0x17f   :  { %403 = vmatpush.msrb.mxu2 %v379_v21  ;;  %v374_v33 = vsel %vm342_vm1, %v315_v63, %v486_v30 }
 0x181   :  { %404 = vmatpush.msrb.mxu2 %v378_v24 }
 0x183   :  { %405 = vmatpush.msrb.mxu2 %v377_v27 }
 0x185   :  { %406 = vmatpush.msrb.mxu2 %v376_v29 }
 0x187   :  { %407 = vmatpush.msrb.mxu2 %v375_v31 }
 0x189   :  { %408 = vmatpush.msrb.mxu2 %v374_v33 }
 0x18a   :  { %494 = vmatmul.msk.f32.vlgmr.msrb.gmra.mxu2 %vm292_vm9, %v382_v32 }
 0x20d   :  { %v410_v36 = vpop.f32.mrf.mxu2 }
 0x20e   :  { %v411_v37 = vadd.f32 %v410_v36, %v389_v35 }
 0x210   :  { %413 = vst [vmem:[#allocation3] sm:$0x1] %v411_v37 }
 0x211   :  { %424 = dma.vmem_to_hbm [thread:$0]  %s420_s27, 16, %s422_s30, [#allocation4]  }
 0x212   :  { %572 = dma.done.wait [#allocation4], 16  }
 0x213   :  { %573 = vsyncadd [#allocation4], 4294967280 }
 0x214   :  { %429 = vsyncpa [#allocation4], 1 }

</bundles_post_ra>
